<compile_context>
chip_gen: v7x
topology: tpu7x:2x2x1
jax: 0.10.0
libtpu: 0.0.40
codegen_flags: <defaults>
</compile_context>

<pallas_src>
import functools

import jax
import jax.numpy as jnp
from jax.experimental import pallas as pl
from jax.experimental.pallas import tpu as pltpu


def _regressor1_kernel(x_ref, w1_ref, b1_ref, w2_ref, b2_ref, out_ref):
    # hidden = sigmoid(x @ W1 + b1)   (MXU matmul, f32 accumulate, EUP sigmoid)
    h = jnp.dot(x_ref[...], w1_ref[...], preferred_element_type=jnp.float32)
    h = jax.nn.sigmoid(h + b1_ref[...])              # (TB, H*) + (1, H*) broadcast
    # output = hidden @ W2 + b2  (no activation, matches the PyTorch forward)
    o = jnp.dot(h.astype(w2_ref.dtype), w2_ref[...],
                preferred_element_type=jnp.float32)
    out_ref[...] = (o + b2_ref[...]).astype(out_ref.dtype)


def _choose_batch_tile(rows, max_tile_rows):
    """Pick (tile_rows, grid_size). Multi-step grids are kept even so the two
    v7x TensorCores get balanced work under dimension_semantics=("parallel",)."""
    if rows <= max_tile_rows:
        return rows, 1                      # single full-extent block (always legal)
    n_steps = pl.cdiv(rows, max_tile_rows)
    if n_steps % 2:
        n_steps += 1                        # even step count for 2-TC balance
    tile = pl.cdiv(rows, n_steps)
    tile = ((tile + 7) // 8) * 8            # sublane-aligned block rows
    return tile, pl.cdiv(rows, tile)


@functools.partial(jax.jit, static_argnames=("block_rows", "compute_dtype"))
def regressor1_forward(x, w1, b1, w2, b2, *, block_rows=32768,
                       compute_dtype=jnp.bfloat16):
    """x: (B, D_in); w1: (D_in, H); b1: (1, H); w2: (H, D_out); b2: (1, D_out)."""
    B, D_in = x.shape
    H = w1.shape[1]
    D_out = w2.shape[1]

    # Lane-densifying batch fold: pack `fold` rows per lane-row (free reshape)
    # and expand the tiny weights to block-diagonal form.  fold=8 -> x tiles are
    # 128-lane dense, sigmoid 100% lanes, output 64 lanes instead of 8.
    fold = 1
    for f in (8, 4, 2):
        if B % f == 0:
            fold = f
            break
    rows = B // fold

    if fold > 1:
        eye = jnp.eye(fold, dtype=w1.dtype)
        w1p = jnp.kron(eye, w1)             # (fold*D_in, fold*H) block-diag
        w2p = jnp.kron(eye, w2)             # (fold*H, fold*D_out) block-diag
        b1p = jnp.tile(b1, (1, fold))       # (1, fold*H)
        b2p = jnp.tile(b2, (1, fold))       # (1, fold*D_out)
    else:
        w1p, w2p, b1p, b2p = w1, w2, b1, b2

    # bf16 streaming for x / weights; biases and accumulation stay f32.
    xp = x.reshape(rows, fold * D_in).astype(compute_dtype)
    w1p = w1p.astype(compute_dtype)
    w2p = w2p.astype(compute_dtype)
    b1p = b1p.astype(jnp.float32)
    b2p = b2p.astype(jnp.float32)

    max_tile_rows = max(8, block_rows // fold)
    tile, n_steps = _choose_batch_tile(rows, max_tile_rows)

    flops = 2 * B * fold * (D_in * H + H * D_out)
    itemsize = jnp.dtype(compute_dtype).itemsize
    bytes_accessed = (B * D_in * itemsize + B * D_out * 4
                      + (w1p.size + w2p.size) * itemsize
                      + (b1p.size + b2p.size) * 4)
    cost = pl.CostEstimate(flops=flops, transcendentals=B * H,
                           bytes_accessed=bytes_accessed)

    out = pl.pallas_call(
        _regressor1_kernel,
        out_shape=jax.ShapeDtypeStruct((rows, fold * D_out), jnp.float32),
        grid_spec=pltpu.PrefetchScalarGridSpec(
            num_scalar_prefetch=0,
            grid=(n_steps,),
            in_specs=[
                # Streamed activations: one batch tile per grid step (ragged
                # last block handled by Pallas; rows are independent).
                pl.BlockSpec((tile, fold * D_in), lambda i: (i, 0)),
                # Tiny weights/biases: constant block index -> VMEM-resident.
                pl.BlockSpec(w1p.shape, lambda i: (0, 0)),
                pl.BlockSpec(b1p.shape, lambda i: (0, 0)),
                pl.BlockSpec(w2p.shape, lambda i: (0, 0)),
                pl.BlockSpec(b2p.shape, lambda i: (0, 0)),
            ],
            out_specs=pl.BlockSpec((tile, fold * D_out), lambda i: (i, 0)),
        ),
        compiler_params=pltpu.CompilerParams(
            dimension_semantics=("parallel",),
            vmem_limit_bytes=32 * 1024 * 1024,
        ),
        cost_estimate=cost,
    )(xp, w1p, b1p, w2p, b2p)

    return out.reshape(B, D_out)


def init_params(key, input_size, hidden_size1, output_size):
    """PyTorch-style uniform(-1/sqrt(fan_in), 1/sqrt(fan_in)) init.
    Weights are stored transposed as (in, out) for the kernel."""
    k1, k2, k3, k4 = jax.random.split(key, 4)
    bound1 = 1.0 / jnp.sqrt(input_size)
    bound2 = 1.0 / jnp.sqrt(hidden_size1)
    w1 = jax.random.uniform(k1, (input_size, hidden_size1), jnp.float32,
                            -bound1, bound1)
    b1 = jax.random.uniform(k2, (1, hidden_size1), jnp.float32, -bound1, bound1)
    w2 = jax.random.uniform(k3, (hidden_size1, output_size), jnp.float32,
                            -bound2, bound2)
    b2 = jax.random.uniform(k4, (1, output_size), jnp.float32, -bound2, bound2)
    return w1, b1, w2, b2


def _ref_forward(x, w1, b1, w2, b2, dt):
    """Plain-JAX reference applying the same dtype casts as the kernel."""
    h = jax.nn.sigmoid(
        jnp.dot(x.astype(dt), w1.astype(dt),
                preferred_element_type=jnp.float32) + b1)
    return jnp.dot(h.astype(dt), w2.astype(dt),
                   preferred_element_type=jnp.float32) + b2


if __name__ == "__main__":
    key = jax.random.PRNGKey(0)
    batch, input_size, hidden_size1, output_size = 8, 16, 32, 8

    kx, kp = jax.random.split(key)
    x = jax.random.normal(kx, (batch, input_size), jnp.float32)
    w1, b1, w2, b2 = init_params(kp, input_size, hidden_size1, output_size)

    out = jax.block_until_ready(regressor1_forward(x, w1, b1, w2, b2))
    assert out.shape == (batch, output_size)
    ref = _ref_forward(x, w1, b1, w2, b2, jnp.bfloat16)
    ref32 = jax.nn.sigmoid(x @ w1 + b1) @ w2 + b2
    assert jnp.allclose(out, ref, atol=1e-3, rtol=1e-3)
    assert jnp.allclose(out, ref32, atol=3e-2, rtol=3e-2)   # bf16 vs f32 reference

    # Prime batch -> exercises the fold=1 (no packing) path.
    batch2 = 1031
    x2 = jax.random.normal(jax.random.PRNGKey(1), (batch2, input_size), jnp.float32)
    out2 = jax.block_until_ready(regressor1_forward(x2, w1, b1, w2, b2))
    ref2 = _ref_forward(x2, w1, b1, w2, b2, jnp.bfloat16)
    assert out2.shape == (batch2, output_size)
    assert jnp.allclose(out2, ref2, atol=1e-3, rtol=1e-3)

    # Multi-step, even grid with a ragged last block (small block_rows to force it).
    batch3 = 20000
    x3 = jax.random.normal(jax.random.PRNGKey(2), (batch3, input_size), jnp.float32)
    out3 = jax.block_until_ready(
        regressor1_forward(x3, w1, b1, w2, b2, block_rows=4096))
    ref3 = _ref_forward(x3, w1, b1, w2, b2, jnp.bfloat16)
    assert out3.shape == (batch3, output_size)
    assert jnp.allclose(out3, ref3, atol=1e-3, rtol=1e-3)

    print("KERNEL_OK")
</pallas_src>

<mosaic_0001>
module attributes {stable_mosaic.version = 11 : i64} {
  func.func @_regressor1_kernel(%arg0: i32, %arg1: memref<1x128xbf16, #tpu.memory_space<vmem>>, %arg2: memref<128x256xbf16, #tpu.memory_space<vmem>>, %arg3: memref<1x256xf32, #tpu.memory_space<vmem>>, %arg4: memref<256x64xbf16, #tpu.memory_space<vmem>>, %arg5: memref<1x64xf32, #tpu.memory_space<vmem>>, %arg6: memref<1x64xf32, #tpu.memory_space<vmem>>) attributes {dimension_semantics = [#tpu.dimension_semantics<parallel>], iteration_bounds = array<i64: 1>, scalar_prefetch = 0 : i64, scratch_operands = 0 : i64, tpu.core_type = #tpu.core_type<tc>, window_params = [{transform_indices = @transform_0, window_bounds = array<i64: 1, 128>}, {pipeline_mode = #tpu.pipeline_mode<synchronous>, transform_indices = @transform_1, window_bounds = array<i64: 128, 256>}, {pipeline_mode = #tpu.pipeline_mode<synchronous>, transform_indices = @transform_2, window_bounds = array<i64: 1, 256>}, {pipeline_mode = #tpu.pipeline_mode<synchronous>, transform_indices = @transform_3, window_bounds = array<i64: 256, 64>}, {pipeline_mode = #tpu.pipeline_mode<synchronous>, transform_indices = @transform_4, window_bounds = array<i64: 1, 64>}, {transform_indices = @transform_5, window_bounds = array<i64: 1, 64>}]} {
    %c0 = arith.constant 0 : index
    %c0_0 = arith.constant 0 : index
    %0 = vector.load %arg1[%c0, %c0_0] : memref<1x128xbf16, #tpu.memory_space<vmem>>, vector<1x128xbf16>
    %c0_1 = arith.constant 0 : index
    %c0_2 = arith.constant 0 : index
    %1 = vector.load %arg2[%c0_1, %c0_2] : memref<128x256xbf16, #tpu.memory_space<vmem>>, vector<128x256xbf16>
    %cst = arith.constant dense<0.000000e+00> : vector<1x256xf32>
    %2 = tpu.matmul %0, %1, %cst {dimension_numbers = #tpu.dot_dimension_numbers<[1], [0], [0], [1], [0, 0, 1, 1], [], []>} : vector<1x128xbf16>, vector<128x256xbf16>, vector<1x256xf32> -> vector<1x256xf32>
    %c0_3 = arith.constant 0 : index
    %c0_4 = arith.constant 0 : index
    %3 = vector.load %arg3[%c0_3, %c0_4] : memref<1x256xf32, #tpu.memory_space<vmem>>, vector<1x256xf32>
    %4 = arith.addf %2, %3 : vector<1x256xf32>
    %5 = arith.negf %4 : vector<1x256xf32>
    %6 = math.exp %5 : vector<1x256xf32>
    %cst_5 = arith.constant 1.000000e+00 : f32
    %7 = vector.broadcast %cst_5 : f32 to vector<1x256xf32>
    %8 = arith.addf %7, %6 : vector<1x256xf32>
    %9 = arith.divf %7, %8 : vector<1x256xf32>
    %10 = arith.truncf %9 : vector<1x256xf32> to vector<1x256xbf16>
    %c0_6 = arith.constant 0 : index
    %c0_7 = arith.constant 0 : index
    %11 = vector.load %arg4[%c0_6, %c0_7] : memref<256x64xbf16, #tpu.memory_space<vmem>>, vector<256x64xbf16>
    %cst_8 = arith.constant dense<0.000000e+00> : vector<1x64xf32>
    %12 = tpu.matmul %10, %11, %cst_8 {dimension_numbers = #tpu.dot_dimension_numbers<[1], [0], [0], [1], [0, 0, 1, 1], [], []>} : vector<1x256xbf16>, vector<256x64xbf16>, vector<1x64xf32> -> vector<1x64xf32>
    %c0_9 = arith.constant 0 : index
    %c0_10 = arith.constant 0 : index
    %13 = vector.load %arg5[%c0_9, %c0_10] : memref<1x64xf32, #tpu.memory_space<vmem>>, vector<1x64xf32>
    %14 = arith.addf %12, %13 : vector<1x64xf32>
    %c0_11 = arith.constant 0 : index
    %c0_12 = arith.constant 0 : index
    %15 = vector.load %arg6[%c0_11, %c0_12] : memref<1x64xf32, #tpu.memory_space<vmem>>, vector<1x64xf32>
    tpu.vector_store %arg6[%c0_11, %c0_12], %14 {strides = array<i32>} : memref<1x64xf32, #tpu.memory_space<vmem>>, vector<1x64xf32>,
    return
  }
  func.func @transform_0(%arg0: i32) -> (i32, i32) {
    %c0_i32 = arith.constant 0 : i32
    %c0_i32_0 = arith.constant 0 : i32
    return %arg0, %c0_i32 : i32, i32
  }
  func.func @transform_1(%arg0: i32) -> (i32, i32) {
    %c0_i32 = arith.constant 0 : i32
    %c0_i32_0 = arith.constant 0 : i32
    %c0_i32_1 = arith.constant 0 : i32
    return %c0_i32, %c0_i32_0 : i32, i32
  }
  func.func @transform_2(%arg0: i32) -> (i32, i32) {
    %c0_i32 = arith.constant 0 : i32
    %c0_i32_0 = arith.constant 0 : i32
    %c0_i32_1 = arith.constant 0 : i32
    return %c0_i32, %c0_i32_0 : i32, i32
  }
  func.func @transform_3(%arg0: i32) -> (i32, i32) {
    %c0_i32 = arith.constant 0 : i32
    %c0_i32_0 = arith.constant 0 : i32
    %c0_i32_1 = arith.constant 0 : i32
    return %c0_i32, %c0_i32_0 : i32, i32
  }
  func.func @transform_4(%arg0: i32) -> (i32, i32) {
    %c0_i32 = arith.constant 0 : i32
    %c0_i32_0 = arith.constant 0 : i32
    %c0_i32_1 = arith.constant 0 : i32
    return %c0_i32, %c0_i32_0 : i32, i32
  }
  func.func @transform_5(%arg0: i32) -> (i32, i32) {
    %c0_i32 = arith.constant 0 : i32
    %c0_i32_0 = arith.constant 0 : i32
    return %arg0, %c0_i32 : i32, i32
  }
}

</mosaic_0001>

<bundles_post_ra>
// kernel: regressor1_forward.1
= control target key start
LH: loop header
LB: loop body
LE: loop exit
PB: predicated region body
PF: predicated region fallthrough
CT: control target
= control target key end

     0   :  { %v465_v1 = vmov 0   ;;  %v120_v34 = vlaneseq  ;;  %vm354_vm0 = vcmask 516096   ;;  %s604_s1 = inlined_call_operand.vmem [shape: bf16[128,256], index: 1, kind: input, shape index: {}]   ;;  %s605_s0 = inlined_call_operand.vmem [shape: bf16[1,128], index: 0, kind: input, shape index: {}]   ;;  %s606_s3 = inlined_call_operand.vmem [shape: bf16[256,64], index: 3, kind: input, shape index: {}]   ;;  %s607_s2 = inlined_call_operand.vmem [shape: f32[1,256], index: 2, kind: input, shape index: {}]   ;;  %s608_s4 = inlined_call_operand.vmem [shape: f32[1,64], index: 4, kind: input, shape index: {}]   ;;  %s609_s5 = inlined_call_operand.vmem [shape: f32[1,64], index: 5, kind: output, shape index: {}]  }
   0x1   :  { %v417_v0 = vld [vmem:[%s604_s1 + $0x4] ss:$8 sps:$4 sm:$0xff]   ;;  %162 = vmatprep.mubr.bf16.mxu0 %v465_v1  ;;  %v419_v2 = vld [vmem:[%s604_s1] ss:$8 sps:$4 sm:$0xff]   ;;  %v420_v3 = vld [vmem:[%s604_s1 + $0x14] ss:$8 sps:$4 sm:$0xff]  }
   0x2   :  { %130 = vmatprep.subr.bf16.mxu0 %v417_v0  ;;  %v422_v4 = vld [vmem:[%s604_s1 + $0x10] ss:$8 sps:$4 sm:$0xff]   ;;  %v423_v5 = vld [vmem:[%s604_s1 + $0x24] ss:$8 sps:$4 sm:$0xff]   ;;  %v425_v6 = vld [vmem:[%s604_s1 + $0x20] ss:$8 sps:$4 sm:$0xff]  }
   0x3   :  { %131 = vmatpush1.bf16.msra.mxu0 %v419_v2  ;;  %v426_v7 = vld [vmem:[%s604_s1 + $0x34] ss:$8 sps:$4 sm:$0xff]   ;;  %v428_v8 = vld [vmem:[%s604_s1 + $0x30] ss:$8 sps:$4 sm:$0xff]   ;;  %v429_v9 = vld [vmem:[%s604_s1 + $0x44] ss:$8 sps:$4 sm:$0xff]  }
   0x4   :  { %132 = vmatprep.subr.bf16.mxu0 %v420_v3  ;;  %v431_v10 = vld [vmem:[%s604_s1 + $0x40] ss:$8 sps:$4 sm:$0xff]   ;;  %v432_v11 = vld [vmem:[%s604_s1 + $0x54] ss:$8 sps:$4 sm:$0xff]   ;;  %v434_v12 = vld [vmem:[%s604_s1 + $0x50] ss:$8 sps:$4 sm:$0xff]  }
   0x5   :  { %v435_v13 = vld [vmem:[%s604_s1 + $0x64] ss:$8 sps:$4 sm:$0xff]   ;;  %v437_v14 = vld [vmem:[%s604_s1 + $0x60] ss:$8 sps:$4 sm:$0xff]   ;;  %v438_v15 = vld [vmem:[%s604_s1 + $0x74] ss:$8 sps:$4 sm:$0xff]  }
   0x6   :  { %v440_v16 = vld [vmem:[%s604_s1 + $0x70] ss:$8 sps:$4 sm:$0xff]   ;;  %v21_v17 = vld [vmem:[%s605_s0] sm:$0x1]  ;;  %v443_v20 = vld [vmem:[%s606_s3 + $0x48] sm:$0xff]   ;;  %v121_v35 = vshrl.u32 %v120_v34, 7 }
   0x7   :  { %133 = vmatpush1.bf16.msra.mxu0 %v422_v4  ;;  %v441_v18 = vld [vmem:[%s606_s3 + $0x40] sm:$0xff]   ;;  %v444_v21 = vld [vmem:[%s606_s3 + $0x8] sm:$0xff]   ;;  %v445_v22 = vld [vmem:[%s606_s3 + $0x50] sm:$0xff]  }
   0x8   :  { %134 = vmatprep.subr.bf16.mxu0 %v423_v5  ;;  %v442_v19 = vld [vmem:[%s606_s3] sm:$0xff]   ;;  %394 = vmatprep.subr.bf16.mxu1 %v441_v18  ;;  %v446_v23 = vld [vmem:[%s606_s3 + $0x10] sm:$0xff]   ;;  %v447_v24 = vld [vmem:[%s606_s3 + $0x58] sm:$0xff]   ;;  %v122_v36 = vsub.s32 0, %v121_v35  ;;  %v126_v38 = vsub.s32 1, %v121_v35 }
   0x9   :  { %395 = vmatpush3.bf16.msra.mxu1 %v442_v19  ;;  %v448_v25 = vld [vmem:[%s606_s3 + $0x18] sm:$0xff]   ;;  %v449_v26 = vld [vmem:[%s606_s3 + $0x60] sm:$0xff]   ;;  %v451_v28 = vld [vmem:[%s606_s3 + $0x68] sm:$0xff]  }
   0xa   :  { %396 = vmatprep.subr.bf16.mxu1 %v443_v20  ;;  %v450_v27 = vld [vmem:[%s606_s3 + $0x20] sm:$0xff]   ;;  %v452_v29 = vld [vmem:[%s606_s3 + $0x28] sm:$0xff]   ;;  %v453_v30 = vld [vmem:[%s606_s3 + $0x70] sm:$0xff]  }
   0xb   :  { %135 = vmatpush1.bf16.msra.mxu0 %v425_v6  ;;  %v454_v31 = vld [vmem:[%s606_s3 + $0x30] sm:$0xff]   ;;  %v455_v32 = vld [vmem:[%s606_s3 + $0x78] sm:$0xff]   ;;  %v38_v37 = vld [vmem:[%s607_s2] sm:$0x3] }
   0xc   :  { %136 = vmatprep.subr.bf16.mxu0 %v426_v7  ;;  %v456_v33 = vld [vmem:[%s606_s3 + $0x38] sm:$0xff]   ;;  %v123_v39 = vrot.slane %v38_v37, %v122_v36  ;;  %v127_v40 = vrot.slane %v38_v37, %v126_v38  ;;  %v217_v58 = vld [vmem:[%s608_s4] sm:$0x1] }
   0xd   :  { %397 = vmatpush3.bf16.msra.mxu1 %v444_v21 }
   0xe   :  { %398 = vmatprep.subr.bf16.mxu1 %v445_v22 }
   0xf   :  { %137 = vmatpush1.bf16.msra.mxu0 %v428_v8 }
  0x10   :  { %138 = vmatprep.subr.bf16.mxu0 %v429_v9 }
  0x11   :  { %399 = vmatpush3.bf16.msra.mxu1 %v446_v23 }
  0x12   :  { %400 = vmatprep.subr.bf16.mxu1 %v447_v24 }
  0x13   :  { %139 = vmatpush1.bf16.msra.mxu0 %v431_v10 }
  0x14   :  { %140 = vmatprep.subr.bf16.mxu0 %v432_v11 }
  0x15   :  { %401 = vmatpush3.bf16.msra.mxu1 %v448_v25 }
  0x16   :  { %402 = vmatprep.subr.bf16.mxu1 %v449_v26 }
  0x17   :  { %141 = vmatpush1.bf16.msra.mxu0 %v434_v12 }
  0x18   :  { %142 = vmatprep.subr.bf16.mxu0 %v435_v13 }
  0x19   :  { %403 = vmatpush3.bf16.msra.mxu1 %v450_v27 }
  0x1a   :  { %404 = vmatprep.subr.bf16.mxu1 %v451_v28 }
  0x1b   :  { %143 = vmatpush1.bf16.msra.mxu0 %v437_v14 }
  0x1c   :  { %144 = vmatprep.subr.bf16.mxu0 %v438_v15 }
  0x1d   :  { %405 = vmatpush3.bf16.msra.mxu1 %v452_v29 }
  0x1e   :  { %406 = vmatprep.subr.bf16.mxu1 %v453_v30 }
  0x1f   :  { %145 = vmatpush1.bf16.msra.mxu0 %v440_v16 }
  0x21   :  { %407 = vmatpush3.bf16.msra.mxu1 %v454_v31 }
  0x22   :  { %163 = vmatmul.mubr.bf16.vlgmr.msra.gmra.mrb[0].mxu0 %v21_v17  ;;  %408 = vmatprep.subr.bf16.mxu1 %v455_v32 }
  0x25   :  { %409 = vmatpush3.bf16.msra.mxu1 %v456_v33 }
  0xf5   :  { %v164_v41 = vpop.f32.mrb[0].mxu0 }
  0xf6   :  { %v165_v42 = vadd.f32 %v164_v41, %v123_v39  ;;  %v166_v43 = vpop.f32.mrb[1].mxu0 }
  0xf7   :  { %v167_v44 = vadd.f32 %v166_v43, %v127_v40  ;;  %v168_v45 = vpop.f32.mrb[2].mxu0 }
  0xf8   :  { %v376_v46 = vmul.f32 -1.442695, %v165_v42  ;;  %v169_v47 = vpop.f32.mrb[3].mxu0 }
  0xf9   :  { %v377_v48 = vmul.f32 -1.442695, %v167_v44 }
  0xfa   :  { %457 = vpow2.f32 %v376_v46 }
  0xfb   :  { %459 = vpow2.f32 %v377_v48 }
 0x104   :  { %v458_v49 = vpop.eup %457 }
 0x105   :  { %v460_v50 = vpop.eup %459  ;;  %v177_v51 = vadd.f32 1.0, %v458_v49 }
 0x106   :  { %v178_v52 = vadd.f32 1.0, %v460_v50 }
 0x107   :  { %461 = vrcp.f32 %v177_v51 }
 0x108   :  { %463 = vrcp.f32 %v178_v52 }
 0x111   :  { %v462_v53 = vpop.eup %461 }
 0x112   :  { %v464_v54 = vpop.eup %463  ;;  %v183_v56 = vpack.c.bf16 %v462_v53, %v462_v53 }
 0x113   :  { %v184_v55 = vpack.c.bf16 %v464_v54, %v464_v54 }
 0x115   :  { %346 = vmatprep.mubr.bf16.mxu1 %v184_v55 }
 0x116   :  { %347 = vmatmul.mubr.bf16.vlgmr.msra.gmra.mrb[0].mxu1 %v183_v56 }
 0x1e9   :  { %v410_v57 = vpop.f32.mrb[0].mxu1 }
 0x1ea   :  { %v411_v59 = vpop.f32.mrb[1].mxu1 }
 0x1eb   :  { %v412_v60 = vadd.f32 %v411_v59, %v410_v57  ;;  %v413_v61 = vpop.f32.mrb[2].mxu1 }
 0x1ec   :  { %v414_v62 = vpop.f32.mrb[3].mxu1 }
 0x1ed   :  { %v349_v63 = vadd.f32 %v412_v60, %v217_v58 }
 0x1ef   :  { %355 = vst.msk [vmem:[%s609_s5] sm:$0x1] %vm354_vm0, %v349_v63 }

</bundles_post_ra>
